<compile_context>
chip_gen: v7x
topology: tpu7x:2x2x1
jax: 0.10.0
libtpu: 0.0.40
codegen_flags: <defaults>
</compile_context>

<pallas_src>
import functools
import math

import jax
import jax.numpy as jnp
from jax.experimental import pallas as pl
from jax.experimental.pallas import tpu as pltpu


# ---------------------------------------------------------------------------
# Shared math
# ---------------------------------------------------------------------------
def _layernorm(x, gamma, beta, eps=1e-5):
    # PyTorch nn.LayerNorm: biased variance over last dim, eps inside rsqrt.
    mu = jnp.mean(x, axis=-1, keepdims=True)
    var = jnp.mean(jnp.square(x - mu), axis=-1, keepdims=True)
    return (x - mu) * jax.lax.rsqrt(var + eps) * gamma + beta


# ---------------------------------------------------------------------------
# Kernel (single program: whole batch resident in VMEM)
# ---------------------------------------------------------------------------
def encoder_block_kernel(q_hm_ref, k_hm_ref, v_hm_ref, q_res_ref, mask_ref,
                         wq_ref, wk_ref, wv_ref, wo_ref, bo_ref,
                         g1_ref, be1_ref, g2_ref, be2_ref,
                         w1_ref, bf1_ref, w2_ref, bf2_ref,
                         out_ref, *, batch, seq_len, num_heads):
    N, L, H = batch, seq_len, num_heads
    NL, D = q_res_ref.shape                # (N*L, D)
    d_k = D // H
    cdt = wq_ref.dtype                     # matmul compute dtype (f32 or bf16)

    # ---- per-head projections: one (N*H*L, d_k) @ (d_k, d_k) matmul each.
    # 1/sqrt(d_k) is already folded into wq (wrapper, weight-side).
    qp = jnp.dot(q_hm_ref[...].astype(cdt), wq_ref[...],
                 preferred_element_type=jnp.float32)
    kp = jnp.dot(k_hm_ref[...].astype(cdt), wk_ref[...],
                 preferred_element_type=jnp.float32)
    vp = jnp.dot(v_hm_ref[...].astype(cdt), wv_ref[...],
                 preferred_element_type=jnp.float32)
    qp3 = qp.reshape(N * H, L, d_k)        # leading-dim split only (free)
    kp3 = kp.reshape(N * H, L, d_k)
    vp3 = vp.reshape(N * H, L, d_k)

    # ---- scores for every (batch, head) pair in one batched MXU matmul.
    score = jnp.einsum('bqd,bkd->bqk', qp3.astype(cdt), kp3.astype(cdt),
                       preferred_element_type=jnp.float32)        # (N*H, L, L)

    # ---- additive mask bias, computed once; finite large-negative so a fully
    # masked row yields uniform attention instead of NaN.
    bias = jnp.where(mask_ref[...] == 0, -1e30, 0.0)              # (N, L, L) f32
    score4 = score.reshape(N, H, L, L) + bias[:, None, :, :]

    # ---- numerically stable softmax in f32; divide moved to EUP (approx recip).
    m = jnp.max(score4, axis=-1, keepdims=True)
    p = jnp.exp(score4 - m)
    denom = jnp.sum(p, axis=-1, keepdims=True)
    attn = p * pl.reciprocal(denom, approx=True)                  # (N, H, L, L)

    ctx = jnp.einsum('bqk,bkd->bqd',
                     attn.reshape(N * H, L, L).astype(cdt), vp3.astype(cdt),
                     preferred_element_type=jnp.float32)          # (N*H, L, d_k)
    ctx4 = ctx.reshape(N, H, L, d_k)

    # ---- output projection W_O as accumulated per-head (d_k, D) slabs:
    # head select is a leading-dim index, no lane slicing / concatenation.
    context = jnp.zeros((NL, D), jnp.float32)
    for h in range(H):
        ctx_h = ctx4[:, h, :, :].reshape(NL, d_k)
        context = context + jnp.dot(ctx_h.astype(cdt), wo_ref[h],
                                    preferred_element_type=jnp.float32)
    context = context + bo_ref[...]

    # ---- residual + LayerNorm 1 (dropout == identity in eval mode).
    x = _layernorm(context + q_res_ref[...], g1_ref[...], be1_ref[...])

    # ---- FFN: Linear -> ReLU -> Linear (f32 accumulation / elementwise).
    h1 = jnp.dot(x.astype(cdt), w1_ref[...], preferred_element_type=jnp.float32)
    h1 = jnp.maximum(h1 + bf1_ref[...], 0.0)
    ffn = jnp.dot(h1.astype(cdt), w2_ref[...], preferred_element_type=jnp.float32)
    ffn = ffn + bf2_ref[...]

    # ---- residual + LayerNorm 2 (dropout == identity in eval mode).
    out = _layernorm(x + ffn, g2_ref[...], be2_ref[...])
    out_ref[...] = out.astype(out_ref.dtype)


# ---------------------------------------------------------------------------
# Wrapper
# ---------------------------------------------------------------------------
def encoder_block(q, k, v, mask, params, num_heads, compute_dtype=jnp.float32):
    """Pallas forward pass of EncoderBlock (eval mode).

    q/k/v: (N, L, D) float32; mask: (N, L, L), 0 = masked-out key position.
    compute_dtype: dtype fed to the MXU (float32 or bfloat16 — the latter is the
    v6e/v7x recommendation); accumulation, softmax and LayerNorm stay float32.
    """
    N, L, D = q.shape
    H = num_heads
    d_k = D // H
    Dff = params["w1"].shape[1]

    # Layout plumbing (wrapper/XLA side): heads onto a leading axis so the kernel
    # never lane-slices or transposes.
    def to_head_major(x):
        return x.reshape(N, L, H, d_k).transpose(0, 2, 1, 3).reshape(N * H * L, d_k)

    q_hm, k_hm, v_hm = to_head_major(q), to_head_major(k), to_head_major(v)
    q_res = q.reshape(N * L, D)                       # row-major q for the residual

    # Weight-side (trace-level) transforms.
    cdt = compute_dtype
    wq = (params["wq"] * (1.0 / math.sqrt(d_k))).astype(cdt)   # fold 1/sqrt(d_k)
    wk = params["wk"].astype(cdt)
    wv = params["wv"].astype(cdt)
    wo = params["wo"].reshape(H, d_k, D).astype(cdt)           # per-head slabs
    w1 = params["w1"].astype(cdt)
    w2 = params["w2"].astype(cdt)

    kernel = functools.partial(encoder_block_kernel,
                               batch=N, seq_len=L, num_heads=H)

    def full(shape):
        return pl.BlockSpec(shape, lambda i, _n=len(shape): (0,) * _n)

    in_specs = [
        full((N * H * L, d_k)), full((N * H * L, d_k)), full((N * H * L, d_k)),
        full((N * L, D)), full((N, L, L)),
        full((d_k, d_k)), full((d_k, d_k)), full((d_k, d_k)),
        full((H, d_k, D)), full((1, D)),
        full((1, D)), full((1, D)), full((1, D)), full((1, D)),
        full((D, Dff)), full((1, Dff)), full((Dff, D)), full((1, D)),
    ]

    out2d = pl.pallas_call(
        kernel,
        out_shape=jax.ShapeDtypeStruct((N * L, D), q.dtype),
        grid=(1,),                                   # single program, whole batch
        in_specs=in_specs,
        out_specs=full((N * L, D)),
        compiler_params=pltpu.CompilerParams(dimension_semantics=("arbitrary",)),
    )(q_hm, k_hm, v_hm, q_res, mask,
      wq, wk, wv, wo, params["bo"],
      params["g1"], params["be1"], params["g2"], params["be2"],
      w1, params["bf1"], w2, params["bf2"])
    return out2d.reshape(N, L, D)


# ---------------------------------------------------------------------------
# Pure-JAX reference (mirrors the PyTorch forward, eval mode)
# ---------------------------------------------------------------------------
def encoder_block_reference(q, k, v, mask, params, num_heads):
    N, L, D = q.shape
    d_k = D // num_heads
    qh = q.reshape(N, L, num_heads, d_k) @ params["wq"]
    kh = k.reshape(N, L, num_heads, d_k) @ params["wk"]
    vh = v.reshape(N, L, num_heads, d_k) @ params["wv"]
    score = jnp.einsum("nqhd,nkhd->nhqk", qh, kh) / math.sqrt(d_k)
    score = jnp.where(mask[:, None, :, :] == 0, -jnp.inf, score)
    attn = jax.nn.softmax(score, axis=-1)
    ctx = jnp.einsum("nhqk,nkhd->nqhd", attn, vh).reshape(N, L, D)
    context = ctx @ params["wo"] + params["bo"]
    x = _layernorm(context + q, params["g1"], params["be1"])
    ffn = jax.nn.relu(x @ params["w1"] + params["bf1"]) @ params["w2"] + params["bf2"]
    return _layernorm(x + ffn, params["g2"], params["be2"])


# ---------------------------------------------------------------------------
# Main
# ---------------------------------------------------------------------------
if __name__ == "__main__":
    N, L = 2, 8            # batch, seq_len
    D, H, Dff = 32, 4, 64  # d_model, num_heads, d_ff
    d_k = D // H

    key = jax.random.PRNGKey(0)
    ks = jax.random.split(key, 16)

    params = {
        "wq":  jax.random.normal(ks[0], (d_k, d_k), jnp.float32) * 0.2,
        "wk":  jax.random.normal(ks[1], (d_k, d_k), jnp.float32) * 0.2,
        "wv":  jax.random.normal(ks[2], (d_k, d_k), jnp.float32) * 0.2,
        "wo":  jax.random.normal(ks[3], (D, D), jnp.float32) * 0.1,
        "bo":  jax.random.normal(ks[4], (1, D), jnp.float32) * 0.1,
        "g1":  1.0 + jax.random.normal(ks[5], (1, D), jnp.float32) * 0.05,
        "be1": jax.random.normal(ks[6], (1, D), jnp.float32) * 0.05,
        "g2":  1.0 + jax.random.normal(ks[7], (1, D), jnp.float32) * 0.05,
        "be2": jax.random.normal(ks[8], (1, D), jnp.float32) * 0.05,
        "w1":  jax.random.normal(ks[9], (D, Dff), jnp.float32) * 0.1,
        "bf1": jax.random.normal(ks[10], (1, Dff), jnp.float32) * 0.1,
        "w2":  jax.random.normal(ks[11], (Dff, D), jnp.float32) * 0.1,
        "bf2": jax.random.normal(ks[12], (1, D), jnp.float32) * 0.1,
    }

    q = jax.random.normal(ks[13], (N, L, D), jnp.float32)
    k = jax.random.normal(ks[14], (N, L, D), jnp.float32)
    v = jax.random.normal(ks[15], (N, L, D), jnp.float32)
    # Causal mask (mask == 0 -> masked); exercises the additive-bias path.
    mask = jnp.broadcast_to(jnp.tril(jnp.ones((L, L), jnp.int32)), (N, L, L))

    ref = encoder_block_reference(q, k, v, mask, params, num_heads=H)

    # f32 compute path (semantics-preserving); tolerance covers the approximate
    # EUP reciprocal used for the softmax normalization.
    out = jax.block_until_ready(encoder_block(q, k, v, mask, params, num_heads=H))
    assert out.shape == (N, L, D)
    assert jnp.allclose(out, ref, atol=5e-3, rtol=5e-3), "f32 kernel mismatch vs reference"

    # bf16 matmul path (v6e/v7x recommendation): f32 accumulation, looser check.
    out_bf16 = jax.block_until_ready(
        encoder_block(q, k, v, mask, params, num_heads=H,
                      compute_dtype=jnp.bfloat16))
    assert float(jnp.max(jnp.abs(out_bf16 - ref))) < 0.25, "bf16 kernel mismatch vs reference"

    # TODO(synk): nn.Dropout is modeled as identity (eval mode); training-mode
    # stochastic dropout is not implemented.
    print("KERNEL_OK")
</pallas_src>

<mosaic_0001>
module attributes {stable_mosaic.version = 11 : i64} {
  func.func @encoder_block_kernel(%arg0: i32, %arg1: memref<64x8xf32, #tpu.memory_space<vmem>>, %arg2: memref<64x8xf32, #tpu.memory_space<vmem>>, %arg3: memref<64x8xf32, #tpu.memory_space<vmem>>, %arg4: memref<16x32xf32, #tpu.memory_space<vmem>>, %arg5: memref<2x8x8xi32, #tpu.memory_space<vmem>>, %arg6: memref<8x8xf32, #tpu.memory_space<vmem>>, %arg7: memref<8x8xf32, #tpu.memory_space<vmem>>, %arg8: memref<8x8xf32, #tpu.memory_space<vmem>>, %arg9: memref<4x8x32xf32, #tpu.memory_space<vmem>>, %arg10: memref<1x32xf32, #tpu.memory_space<vmem>>, %arg11: memref<1x32xf32, #tpu.memory_space<vmem>>, %arg12: memref<1x32xf32, #tpu.memory_space<vmem>>, %arg13: memref<1x32xf32, #tpu.memory_space<vmem>>, %arg14: memref<1x32xf32, #tpu.memory_space<vmem>>, %arg15: memref<32x64xf32, #tpu.memory_space<vmem>>, %arg16: memref<1x64xf32, #tpu.memory_space<vmem>>, %arg17: memref<64x32xf32, #tpu.memory_space<vmem>>, %arg18: memref<1x32xf32, #tpu.memory_space<vmem>>, %arg19: memref<16x32xf32, #tpu.memory_space<vmem>>) attributes {dimension_semantics = [#tpu.dimension_semantics<arbitrary>], iteration_bounds = array<i64: 1>, scalar_prefetch = 0 : i64, scratch_operands = 0 : i64, tpu.core_type = #tpu.core_type<tc>, window_params = [{pipeline_mode = #tpu.pipeline_mode<synchronous>, transform_indices = @transform_0, window_bounds = array<i64: 64, 8>}, {pipeline_mode = #tpu.pipeline_mode<synchronous>, transform_indices = @transform_1, window_bounds = array<i64: 64, 8>}, {pipeline_mode = #tpu.pipeline_mode<synchronous>, transform_indices = @transform_2, window_bounds = array<i64: 64, 8>}, {pipeline_mode = #tpu.pipeline_mode<synchronous>, transform_indices = @transform_3, window_bounds = array<i64: 16, 32>}, {pipeline_mode = #tpu.pipeline_mode<synchronous>, transform_indices = @transform_4, window_bounds = array<i64: 2, 8, 8>}, {pipeline_mode = #tpu.pipeline_mode<synchronous>, transform_indices = @transform_5, window_bounds = array<i64: 8, 8>}, {pipeline_mode = #tpu.pipeline_mode<synchronous>, transform_indices = @transform_6, window_bounds = array<i64: 8, 8>}, {pipeline_mode = #tpu.pipeline_mode<synchronous>, transform_indices = @transform_7, window_bounds = array<i64: 8, 8>}, {pipeline_mode = #tpu.pipeline_mode<synchronous>, transform_indices = @transform_8, window_bounds = array<i64: 4, 8, 32>}, {pipeline_mode = #tpu.pipeline_mode<synchronous>, transform_indices = @transform_9, window_bounds = array<i64: 1, 32>}, {pipeline_mode = #tpu.pipeline_mode<synchronous>, transform_indices = @transform_10, window_bounds = array<i64: 1, 32>}, {pipeline_mode = #tpu.pipeline_mode<synchronous>, transform_indices = @transform_11, window_bounds = array<i64: 1, 32>}, {pipeline_mode = #tpu.pipeline_mode<synchronous>, transform_indices = @transform_12, window_bounds = array<i64: 1, 32>}, {pipeline_mode = #tpu.pipeline_mode<synchronous>, transform_indices = @transform_13, window_bounds = array<i64: 1, 32>}, {pipeline_mode = #tpu.pipeline_mode<synchronous>, transform_indices = @transform_14, window_bounds = array<i64: 32, 64>}, {pipeline_mode = #tpu.pipeline_mode<synchronous>, transform_indices = @transform_15, window_bounds = array<i64: 1, 64>}, {pipeline_mode = #tpu.pipeline_mode<synchronous>, transform_indices = @transform_16, window_bounds = array<i64: 64, 32>}, {pipeline_mode = #tpu.pipeline_mode<synchronous>, transform_indices = @transform_17, window_bounds = array<i64: 1, 32>}, {pipeline_mode = #tpu.pipeline_mode<synchronous>, transform_indices = @transform_18, window_bounds = array<i64: 16, 32>}]} {
    %c0 = arith.constant 0 : index
    %c0_0 = arith.constant 0 : index
    %0 = vector.load %arg1[%c0, %c0_0] : memref<64x8xf32, #tpu.memory_space<vmem>>, vector<64x8xf32>
    %c0_1 = arith.constant 0 : index
    %c0_2 = arith.constant 0 : index
    %1 = vector.load %arg6[%c0_1, %c0_2] : memref<8x8xf32, #tpu.memory_space<vmem>>, vector<8x8xf32>
    %cst = arith.constant dense<0.000000e+00> : vector<64x8xf32>
    %2 = tpu.matmul %0, %1, %cst {dimension_numbers = #tpu.dot_dimension_numbers<[1], [0], [0], [1], [0, 0, 1, 1], [], []>} : vector<64x8xf32>, vector<8x8xf32>, vector<64x8xf32> -> vector<64x8xf32>
    %c0_3 = arith.constant 0 : index
    %c0_4 = arith.constant 0 : index
    %3 = vector.load %arg2[%c0_3, %c0_4] : memref<64x8xf32, #tpu.memory_space<vmem>>, vector<64x8xf32>
    %c0_5 = arith.constant 0 : index
    %c0_6 = arith.constant 0 : index
    %4 = vector.load %arg7[%c0_5, %c0_6] : memref<8x8xf32, #tpu.memory_space<vmem>>, vector<8x8xf32>
    %cst_7 = arith.constant dense<0.000000e+00> : vector<64x8xf32>
    %5 = tpu.matmul %3, %4, %cst_7 {dimension_numbers = #tpu.dot_dimension_numbers<[1], [0], [0], [1], [0, 0, 1, 1], [], []>} : vector<64x8xf32>, vector<8x8xf32>, vector<64x8xf32> -> vector<64x8xf32>
    %c0_8 = arith.constant 0 : index
    %c0_9 = arith.constant 0 : index
    %6 = vector.load %arg3[%c0_8, %c0_9] : memref<64x8xf32, #tpu.memory_space<vmem>>, vector<64x8xf32>
    %c0_10 = arith.constant 0 : index
    %c0_11 = arith.constant 0 : index
    %7 = vector.load %arg8[%c0_10, %c0_11] : memref<8x8xf32, #tpu.memory_space<vmem>>, vector<8x8xf32>
    %cst_12 = arith.constant dense<0.000000e+00> : vector<64x8xf32>
    %8 = tpu.matmul %6, %7, %cst_12 {dimension_numbers = #tpu.dot_dimension_numbers<[1], [0], [0], [1], [0, 0, 1, 1], [], []>} : vector<64x8xf32>, vector<8x8xf32>, vector<64x8xf32> -> vector<64x8xf32>
    %9 = vector.shape_cast %2 : vector<64x8xf32> to vector<8x8x8xf32>
    %10 = vector.shape_cast %5 : vector<64x8xf32> to vector<8x8x8xf32>
    %11 = vector.shape_cast %8 : vector<64x8xf32> to vector<8x8x8xf32>
    "tpu.trace_start"() <{level = 10 : i32, message = "bqd,bkd->bqk"}> : () -> ()
    %cst_13 = arith.constant dense<0.000000e+00> : vector<8x8x8xf32>
    %12 = tpu.matmul %9, %10, %cst_13 {dimension_numbers = #tpu.dot_dimension_numbers<[2], [2], [1], [1], [0, 0, 0, 1, 1, 1], [0], [0]>} : vector<8x8x8xf32>, vector<8x8x8xf32>, vector<8x8x8xf32> -> vector<8x8x8xf32>
    "tpu.trace_stop"() : () -> ()
    %c0_14 = arith.constant 0 : index
    %c0_15 = arith.constant 0 : index
    %c0_16 = arith.constant 0 : index
    %13 = vector.load %arg5[%c0_14, %c0_15, %c0_16] : memref<2x8x8xi32, #tpu.memory_space<vmem>>, vector<2x8x8xi32>
    %c0_i32 = arith.constant 0 : i32
    %14 = vector.broadcast %c0_i32 : i32 to vector<2x8x8xi32>
    %15 = arith.cmpi eq, %13, %14 : vector<2x8x8xi32>
    %cst_17 = arith.constant -1.000000e+30 : f32
    %cst_18 = arith.constant 0.000000e+00 : f32
    %16 = vector.broadcast %cst_17 : f32 to vector<2x8x8xf32>
    %17 = vector.broadcast %cst_18 : f32 to vector<2x8x8xf32>
    %18 = arith.select %15, %16, %17 : vector<2x8x8xi1>, vector<2x8x8xf32>
    %19 = vector.shape_cast %12 : vector<8x8x8xf32> to vector<2x4x8x8xf32>
    %20 = vector.shape_cast %18 : vector<2x8x8xf32> to vector<2x1x8x8xf32>
    %21 = vector.broadcast %20 : vector<2x1x8x8xf32> to vector<2x4x8x8xf32>
    %22 = arith.addf %19, %21 : vector<2x4x8x8xf32>
    %cst_19 = arith.constant dense<0xFF800000> : vector<2x4x8xf32>
    %23 = vector.multi_reduction <maximumf>, %22, %cst_19 [3] : vector<2x4x8x8xf32> to vector<2x4x8xf32>
    %24 = vector.shape_cast %23 : vector<2x4x8xf32> to vector<2x4x8x1xf32>
    %25 = vector.broadcast %24 : vector<2x4x8x1xf32> to vector<2x4x8x8xf32>
    %26 = arith.subf %22, %25 : vector<2x4x8x8xf32>
    %27 = math.exp %26 : vector<2x4x8x8xf32>
    %cst_20 = arith.constant dense<0.000000e+00> : vector<2x4x8xf32>
    %28 = vector.multi_reduction <add>, %27, %cst_20 [3] : vector<2x4x8x8xf32> to vector<2x4x8xf32>
    %29 = vector.shape_cast %28 : vector<2x4x8xf32> to vector<2x4x8x1xf32>
    %30 = tpu.reciprocal %29 {approx = true} : vector<2x4x8x1xf32> -> vector<2x4x8x1xf32>
    %31 = vector.broadcast %30 : vector<2x4x8x1xf32> to vector<2x4x8x8xf32>
    %32 = arith.mulf %27, %31 : vector<2x4x8x8xf32>
    %33 = vector.shape_cast %32 : vector<2x4x8x8xf32> to vector<8x8x8xf32>
    "tpu.trace_start"() <{level = 10 : i32, message = "bqk,bkd->bqd"}> : () -> ()
    %cst_21 = arith.constant dense<0.000000e+00> : vector<8x8x8xf32>
    %34 = tpu.matmul %33, %11, %cst_21 {dimension_numbers = #tpu.dot_dimension_numbers<[2], [1], [1], [2], [0, 0, 0, 1, 1, 2], [0], [0]>} : vector<8x8x8xf32>, vector<8x8x8xf32>, vector<8x8x8xf32> -> vector<8x8x8xf32>
    "tpu.trace_stop"() : () -> ()
    %35 = vector.shape_cast %34 : vector<8x8x8xf32> to vector<2x4x8x8xf32>
    %cst_22 = arith.constant 0.000000e+00 : f32
    %36 = vector.broadcast %cst_22 : f32 to vector<16x32xf32>
    %37 = vector.extract_strided_slice %35 {offsets = [0, 0, 0, 0], sizes = [2, 1, 8, 8], strides = [1, 1, 1, 1]} : vector<2x4x8x8xf32> to vector<2x1x8x8xf32>
    %38 = vector.shape_cast %37 : vector<2x1x8x8xf32> to vector<2x8x8xf32>
    %39 = vector.shape_cast %38 : vector<2x8x8xf32> to vector<16x8xf32>
    %c0_23 = arith.constant 0 : index
    %c0_24 = arith.constant 0 : index
    %c0_25 = arith.constant 0 : index
    %40 = vector.load %arg9[%c0_23, %c0_24, %c0_25] : memref<4x8x32xf32, #tpu.memory_space<vmem>>, vector<1x8x32xf32>
    %41 = vector.shape_cast %40 : vector<1x8x32xf32> to vector<8x32xf32>
    %cst_26 = arith.constant dense<0.000000e+00> : vector<16x32xf32>
    %42 = tpu.matmul %39, %41, %cst_26 {dimension_numbers = #tpu.dot_dimension_numbers<[1], [0], [0], [1], [0, 0, 1, 1], [], []>} : vector<16x8xf32>, vector<8x32xf32>, vector<16x32xf32> -> vector<16x32xf32>
    %43 = arith.addf %36, %42 : vector<16x32xf32>
    %44 = vector.extract_strided_slice %35 {offsets = [0, 1, 0, 0], sizes = [2, 1, 8, 8], strides = [1, 1, 1, 1]} : vector<2x4x8x8xf32> to vector<2x1x8x8xf32>
    %45 = vector.shape_cast %44 : vector<2x1x8x8xf32> to vector<2x8x8xf32>
    %46 = vector.shape_cast %45 : vector<2x8x8xf32> to vector<16x8xf32>
    %c1 = arith.constant 1 : index
    %c0_27 = arith.constant 0 : index
    %c0_28 = arith.constant 0 : index
    %47 = vector.load %arg9[%c1, %c0_27, %c0_28] : memref<4x8x32xf32, #tpu.memory_space<vmem>>, vector<1x8x32xf32>
    %48 = vector.shape_cast %47 : vector<1x8x32xf32> to vector<8x32xf32>
    %cst_29 = arith.constant dense<0.000000e+00> : vector<16x32xf32>
    %49 = tpu.matmul %46, %48, %cst_29 {dimension_numbers = #tpu.dot_dimension_numbers<[1], [0], [0], [1], [0, 0, 1, 1], [], []>} : vector<16x8xf32>, vector<8x32xf32>, vector<16x32xf32> -> vector<16x32xf32>
    %50 = arith.addf %43, %49 : vector<16x32xf32>
    %51 = vector.extract_strided_slice %35 {offsets = [0, 2, 0, 0], sizes = [2, 1, 8, 8], strides = [1, 1, 1, 1]} : vector<2x4x8x8xf32> to vector<2x1x8x8xf32>
    %52 = vector.shape_cast %51 : vector<2x1x8x8xf32> to vector<2x8x8xf32>
    %53 = vector.shape_cast %52 : vector<2x8x8xf32> to vector<16x8xf32>
    %c2 = arith.constant 2 : index
    %c0_30 = arith.constant 0 : index
    %c0_31 = arith.constant 0 : index
    %54 = vector.load %arg9[%c2, %c0_30, %c0_31] : memref<4x8x32xf32, #tpu.memory_space<vmem>>, vector<1x8x32xf32>
    %55 = vector.shape_cast %54 : vector<1x8x32xf32> to vector<8x32xf32>
    %cst_32 = arith.constant dense<0.000000e+00> : vector<16x32xf32>
    %56 = tpu.matmul %53, %55, %cst_32 {dimension_numbers = #tpu.dot_dimension_numbers<[1], [0], [0], [1], [0, 0, 1, 1], [], []>} : vector<16x8xf32>, vector<8x32xf32>, vector<16x32xf32> -> vector<16x32xf32>
    %57 = arith.addf %50, %56 : vector<16x32xf32>
    %58 = vector.extract_strided_slice %35 {offsets = [0, 3, 0, 0], sizes = [2, 1, 8, 8], strides = [1, 1, 1, 1]} : vector<2x4x8x8xf32> to vector<2x1x8x8xf32>
    %59 = vector.shape_cast %58 : vector<2x1x8x8xf32> to vector<2x8x8xf32>
    %60 = vector.shape_cast %59 : vector<2x8x8xf32> to vector<16x8xf32>
    %c3 = arith.constant 3 : index
    %c0_33 = arith.constant 0 : index
    %c0_34 = arith.constant 0 : index
    %61 = vector.load %arg9[%c3, %c0_33, %c0_34] : memref<4x8x32xf32, #tpu.memory_space<vmem>>, vector<1x8x32xf32>
    %62 = vector.shape_cast %61 : vector<1x8x32xf32> to vector<8x32xf32>
    %cst_35 = arith.constant dense<0.000000e+00> : vector<16x32xf32>
    %63 = tpu.matmul %60, %62, %cst_35 {dimension_numbers = #tpu.dot_dimension_numbers<[1], [0], [0], [1], [0, 0, 1, 1], [], []>} : vector<16x8xf32>, vector<8x32xf32>, vector<16x32xf32> -> vector<16x32xf32>
    %64 = arith.addf %57, %63 : vector<16x32xf32>
    %c0_36 = arith.constant 0 : index
    %c0_37 = arith.constant 0 : index
    %65 = vector.load %arg10[%c0_36, %c0_37] : memref<1x32xf32, #tpu.memory_space<vmem>>, vector<1x32xf32>
    %66 = vector.broadcast %65 : vector<1x32xf32> to vector<16x32xf32>
    %67 = arith.addf %64, %66 : vector<16x32xf32>
    %c0_38 = arith.constant 0 : index
    %c0_39 = arith.constant 0 : index
    %68 = vector.load %arg4[%c0_38, %c0_39] : memref<16x32xf32, #tpu.memory_space<vmem>>, vector<16x32xf32>
    %69 = arith.addf %67, %68 : vector<16x32xf32>
    %c0_40 = arith.constant 0 : index
    %c0_41 = arith.constant 0 : index
    %70 = vector.load %arg11[%c0_40, %c0_41] : memref<1x32xf32, #tpu.memory_space<vmem>>, vector<1x32xf32>
    %c0_42 = arith.constant 0 : index
    %c0_43 = arith.constant 0 : index
    %71 = vector.load %arg12[%c0_42, %c0_43] : memref<1x32xf32, #tpu.memory_space<vmem>>, vector<1x32xf32>
    %cst_44 = arith.constant dense<0.000000e+00> : vector<16xf32>
    %72 = vector.multi_reduction <add>, %69, %cst_44 [1] : vector<16x32xf32> to vector<16xf32>
    %73 = vector.shape_cast %72 : vector<16xf32> to vector<16x1xf32>
    %cst_45 = arith.constant 3.200000e+01 : f32
    %74 = vector.broadcast %cst_45 : f32 to vector<16x1xf32>
    %75 = arith.divf %73, %74 : vector<16x1xf32>
    %76 = vector.broadcast %75 : vector<16x1xf32> to vector<16x32xf32>
    %77 = arith.subf %69, %76 : vector<16x32xf32>
    %78 = arith.mulf %77, %77 : vector<16x32xf32>
    %cst_46 = arith.constant dense<0.000000e+00> : vector<16xf32>
    %79 = vector.multi_reduction <add>, %78, %cst_46 [1] : vector<16x32xf32> to vector<16xf32>
    %80 = vector.shape_cast %79 : vector<16xf32> to vector<16x1xf32>
    %cst_47 = arith.constant 3.200000e+01 : f32
    %81 = vector.broadcast %cst_47 : f32 to vector<16x1xf32>
    %82 = arith.divf %80, %81 : vector<16x1xf32>
    %83 = vector.broadcast %75 : vector<16x1xf32> to vector<16x32xf32>
    %84 = arith.subf %69, %83 : vector<16x32xf32>
    %cst_48 = arith.constant 9.99999974E-6 : f32
    %85 = vector.broadcast %cst_48 : f32 to vector<16x1xf32>
    %86 = arith.addf %82, %85 : vector<16x1xf32>
    %87 = math.rsqrt %86 : vector<16x1xf32>
    %88 = vector.broadcast %87 : vector<16x1xf32> to vector<16x32xf32>
    %89 = arith.mulf %84, %88 : vector<16x32xf32>
    %90 = vector.broadcast %70 : vector<1x32xf32> to vector<16x32xf32>
    %91 = arith.mulf %89, %90 : vector<16x32xf32>
    %92 = vector.broadcast %71 : vector<1x32xf32> to vector<16x32xf32>
    %93 = arith.addf %91, %92 : vector<16x32xf32>
    %c0_49 = arith.constant 0 : index
    %c0_50 = arith.constant 0 : index
    %94 = vector.load %arg15[%c0_49, %c0_50] : memref<32x64xf32, #tpu.memory_space<vmem>>, vector<32x64xf32>
    %cst_51 = arith.constant dense<0.000000e+00> : vector<16x64xf32>
    %95 = tpu.matmul %93, %94, %cst_51 {dimension_numbers = #tpu.dot_dimension_numbers<[1], [0], [0], [1], [0, 0, 1, 1], [], []>} : vector<16x32xf32>, vector<32x64xf32>, vector<16x64xf32> -> vector<16x64xf32>
    %c0_52 = arith.constant 0 : index
    %c0_53 = arith.constant 0 : index
    %96 = vector.load %arg16[%c0_52, %c0_53] : memref<1x64xf32, #tpu.memory_space<vmem>>, vector<1x64xf32>
    %97 = vector.broadcast %96 : vector<1x64xf32> to vector<16x64xf32>
    %98 = arith.addf %95, %97 : vector<16x64xf32>
    %cst_54 = arith.constant 0.000000e+00 : f32
    %99 = vector.broadcast %cst_54 : f32 to vector<16x64xf32>
    %100 = arith.maximumf %98, %99 : vector<16x64xf32>
    %c0_55 = arith.constant 0 : index
    %c0_56 = arith.constant 0 : index
    %101 = vector.load %arg17[%c0_55, %c0_56] : memref<64x32xf32, #tpu.memory_space<vmem>>, vector<64x32xf32>
    %cst_57 = arith.constant dense<0.000000e+00> : vector<16x32xf32>
    %102 = tpu.matmul %100, %101, %cst_57 {dimension_numbers = #tpu.dot_dimension_numbers<[1], [0], [0], [1], [0, 0, 1, 1], [], []>} : vector<16x64xf32>, vector<64x32xf32>, vector<16x32xf32> -> vector<16x32xf32>
    %c0_58 = arith.constant 0 : index
    %c0_59 = arith.constant 0 : index
    %103 = vector.load %arg18[%c0_58, %c0_59] : memref<1x32xf32, #tpu.memory_space<vmem>>, vector<1x32xf32>
    %104 = vector.broadcast %103 : vector<1x32xf32> to vector<16x32xf32>
    %105 = arith.addf %102, %104 : vector<16x32xf32>
    %106 = arith.addf %93, %105 : vector<16x32xf32>
    %c0_60 = arith.constant 0 : index
    %c0_61 = arith.constant 0 : index
    %107 = vector.load %arg13[%c0_60, %c0_61] : memref<1x32xf32, #tpu.memory_space<vmem>>, vector<1x32xf32>
    %c0_62 = arith.constant 0 : index
    %c0_63 = arith.constant 0 : index
    %108 = vector.load %arg14[%c0_62, %c0_63] : memref<1x32xf32, #tpu.memory_space<vmem>>, vector<1x32xf32>
    %cst_64 = arith.constant dense<0.000000e+00> : vector<16xf32>
    %109 = vector.multi_reduction <add>, %106, %cst_64 [1] : vector<16x32xf32> to vector<16xf32>
    %110 = vector.shape_cast %109 : vector<16xf32> to vector<16x1xf32>
    %cst_65 = arith.constant 3.200000e+01 : f32
    %111 = vector.broadcast %cst_65 : f32 to vector<16x1xf32>
    %112 = arith.divf %110, %111 : vector<16x1xf32>
    %113 = vector.broadcast %112 : vector<16x1xf32> to vector<16x32xf32>
    %114 = arith.subf %106, %113 : vector<16x32xf32>
    %115 = arith.mulf %114, %114 : vector<16x32xf32>
    %cst_66 = arith.constant dense<0.000000e+00> : vector<16xf32>
    %116 = vector.multi_reduction <add>, %115, %cst_66 [1] : vector<16x32xf32> to vector<16xf32>
    %117 = vector.shape_cast %116 : vector<16xf32> to vector<16x1xf32>
    %cst_67 = arith.constant 3.200000e+01 : f32
    %118 = vector.broadcast %cst_67 : f32 to vector<16x1xf32>
    %119 = arith.divf %117, %118 : vector<16x1xf32>
    %120 = vector.broadcast %112 : vector<16x1xf32> to vector<16x32xf32>
    %121 = arith.subf %106, %120 : vector<16x32xf32>
    %cst_68 = arith.constant 9.99999974E-6 : f32
    %122 = vector.broadcast %cst_68 : f32 to vector<16x1xf32>
    %123 = arith.addf %119, %122 : vector<16x1xf32>
    %124 = math.rsqrt %123 : vector<16x1xf32>
    %125 = vector.broadcast %124 : vector<16x1xf32> to vector<16x32xf32>
    %126 = arith.mulf %121, %125 : vector<16x32xf32>
    %127 = vector.broadcast %107 : vector<1x32xf32> to vector<16x32xf32>
    %128 = arith.mulf %126, %127 : vector<16x32xf32>
    %129 = vector.broadcast %108 : vector<1x32xf32> to vector<16x32xf32>
    %130 = arith.addf %128, %129 : vector<16x32xf32>
    %c0_69 = arith.constant 0 : index
    %c0_70 = arith.constant 0 : index
    %131 = vector.load %arg19[%c0_69, %c0_70] : memref<16x32xf32, #tpu.memory_space<vmem>>, vector<16x32xf32>
    tpu.vector_store %arg19[%c0_69, %c0_70], %130 {strides = array<i32>} : memref<16x32xf32, #tpu.memory_space<vmem>>, vector<16x32xf32>,
    return
  }
  func.func @transform_0(%arg0: i32) -> (i32, i32) {
    %c0_i32 = arith.constant 0 : i32
    %c0_i32_0 = arith.constant 0 : i32
    %c0_i32_1 = arith.constant 0 : i32
    return %c0_i32, %c0_i32_0 : i32, i32
  }
  func.func @transform_1(%arg0: i32) -> (i32, i32) {
    %c0_i32 = arith.constant 0 : i32
    %c0_i32_0 = arith.constant 0 : i32
    %c0_i32_1 = arith.constant 0 : i32
    return %c0_i32, %c0_i32_0 : i32, i32
  }
  func.func @transform_2(%arg0: i32) -> (i32, i32) {
    %c0_i32 = arith.constant 0 : i32
    %c0_i32_0 = arith.constant 0 : i32
    %c0_i32_1 = arith.constant 0 : i32
    return %c0_i32, %c0_i32_0 : i32, i32
  }
  func.func @transform_3(%arg0: i32) -> (i32, i32) {
    %c0_i32 = arith.constant 0 : i32
    %c0_i32_0 = arith.constant 0 : i32
    %c0_i32_1 = arith.constant 0 : i32
    return %c0_i32, %c0_i32_0 : i32, i32
  }
  func.func @transform_4(%arg0: i32) -> (i32, i32, i32) {
    %c0_i32 = arith.constant 0 : i32
    %c0_i32_0 = arith.constant 0 : i32
    %c0_i32_1 = arith.constant 0 : i32
    %c0_i32_2 = arith.constant 0 : i32
    return %c0_i32, %c0_i32_0, %c0_i32_1 : i32, i32, i32
  }
  func.func @transform_5(%arg0: i32) -> (i32, i32) {
    %c0_i32 = arith.constant 0 : i32
    %c0_i32_0 = arith.constant 0 : i32
    %c0_i32_1 = arith.constant 0 : i32
    return %c0_i32, %c0_i32_0 : i32, i32
  }
  func.func @transform_6(%arg0: i32) -> (i32, i32) {
    %c0_i32 = arith.constant 0 : i32
    %c0_i32_0 = arith.constant 0 : i32
    %c0_i32_1 = arith.constant 0 : i32
    return %c0_i32, %c0_i32_0 : i32, i32
  }
  func.func @transform_7(%arg0: i32) -> (i32, i32) {
    %c0_i32 = arith.constant 0 : i32
    %c0_i32_0 = arith.constant 0 : i32
    %c0_i32_1 = arith.constant 0 : i32
    return %c0_i32, %c0_i32_0 : i32, i32
  }
  func.func @transform_8(%arg0: i32) -> (i32, i32, i32) {
    %c0_i32 = arith.constant 0 : i32
    %c0_i32_0 = arith.constant 0 : i32
    %c0_i32_1 = arith.constant 0 : i32
    %c0_i32_2 = arith.constant 0 : i32
    return %c0_i32, %c0_i32_0, %c0_i32_1 : i32, i32, i32
  }
  func.func @transform_9(%arg0: i32) -> (i32, i32) {
    %c0_i32 = arith.constant 0 : i32
    %c0_i32_0 = arith.constant 0 : i32
    %c0_i32_1 = arith.constant 0 : i32
    return %c0_i32, %c0_i32_0 : i32, i32
  }
  func.func @transform_10(%arg0: i32) -> (i32, i32) {
    %c0_i32 = arith.constant 0 : i32
    %c0_i32_0 = arith.constant 0 : i32
    %c0_i32_1 = arith.constant 0 : i32
    return %c0_i32, %c0_i32_0 : i32, i32
  }
  func.func @transform_11(%arg0: i32) -> (i32, i32) {
    %c0_i32 = arith.constant 0 : i32
    %c0_i32_0 = arith.constant 0 : i32
    %c0_i32_1 = arith.constant 0 : i32
    return %c0_i32, %c0_i32_0 : i32, i32
  }
  func.func @transform_12(%arg0: i32) -> (i32, i32) {
    %c0_i32 = arith.constant 0 : i32
    %c0_i32_0 = arith.constant 0 : i32
    %c0_i32_1 = arith.constant 0 : i32
    return %c0_i32, %c0_i32_0 : i32, i32
  }
  func.func @transform_13(%arg0: i32) -> (i32, i32) {
    %c0_i32 = arith.constant 0 : i32
    %c0_i32_0 = arith.constant 0 : i32
    %c0_i32_1 = arith.constant 0 : i32
    return %c0_i32, %c0_i32_0 : i32, i32
  }
  func.func @transform_14(%arg0: i32) -> (i32, i32) {
    %c0_i32 = arith.constant 0 : i32
    %c0_i32_0 = arith.constant 0 : i32
    %c0_i32_1 = arith.constant 0 : i32
    return %c0_i32, %c0_i32_0 : i32, i32
  }
  func.func @transform_15(%arg0: i32) -> (i32, i32) {
    %c0_i32 = arith.constant 0 : i32
    %c0_i32_0 = arith.constant 0 : i32
    %c0_i32_1 = arith.constant 0 : i32
    return %c0_i32, %c0_i32_0 : i32, i32
  }
  func.func @transform_16(%arg0: i32) -> (i32, i32) {
    %c0_i32 = arith.constant 0 : i32
    %c0_i32_0 = arith.constant 0 : i32
    %c0_i32_1 = arith.constant 0 : i32
    return %c0_i32, %c0_i32_0 : i32, i32
  }
  func.func @transform_17(%arg0: i32) -> (i32, i32) {
    %c0_i32 = arith.constant 0 : i32
    %c0_i32_0 = arith.constant 0 : i32
    %c0_i32_1 = arith.constant 0 : i32
    return %c0_i32, %c0_i32_0 : i32, i32
  }
  func.func @transform_18(%arg0: i32) -> (i32, i32) {
    %c0_i32 = arith.constant 0 : i32
    %c0_i32_0 = arith.constant 0 : i32
    %c0_i32_1 = arith.constant 0 : i32
    return %c0_i32, %c0_i32_0 : i32, i32
  }
}

</mosaic_0001>

<bundles_post_ra>
// kernel: tpu_custom_call.1
= control target key start
LH: loop header
LB: loop body
LE: loop exit
PB: predicated region body
PF: predicated region fallthrough
CT: control target
= control target key end

     0   :  { %s3274_s0 = inlined_call_operand.vmem [shape: f32[64,8], index: 0, kind: input, shape index: {}]   ;;  %s3275_s1 = inlined_call_operand.vmem [shape: f32[64,8], index: 1, kind: input, shape index: {}]   ;;  %s3276_s2 = inlined_call_operand.vmem [shape: f32[64,8], index: 2, kind: input, shape index: {}]   ;;  %s3277_s3 = inlined_call_operand.vmem [shape: f32[16,32], index: 3, kind: input, shape index: {}]   ;;  %s3278_s4 = inlined_call_operand.vmem [shape: s32[2,8,8], index: 4, kind: input, shape index: {}]   ;;  %s3279_s5 = inlined_call_operand.vmem [shape: f32[8,8], index: 5, kind: input, shape index: {}]   ;;  %s3280_s6 = inlined_call_operand.vmem [shape: f32[8,8], index: 6, kind: input, shape index: {}]   ;;  %s3281_s7 = inlined_call_operand.vmem [shape: f32[8,8], index: 7, kind: input, shape index: {}]   ;;  %s3282_s8 = inlined_call_operand.vmem [shape: f32[4,8,32], index: 8, kind: input, shape index: {}]   ;;  %s3283_s9 = inlined_call_operand.vmem [shape: f32[1,32], index: 9, kind: input, shape index: {}]   ;;  %s3284_s10 = inlined_call_operand.vmem [shape: f32[1,32], index: 10, kind: input, shape index: {}]   ;;  %s3285_s11 = inlined_call_operand.vmem [shape: f32[1,32], index: 11, kind: input, shape index: {}]   ;;  %s3286_s12 = inlined_call_operand.vmem [shape: f32[1,32], index: 12, kind: input, shape index: {}]   ;;  %s3287_s13 = inlined_call_operand.vmem [shape: f32[1,32], index: 13, kind: input, shape index: {}]   ;;  %s3288_s14 = inlined_call_operand.vmem [shape: f32[32,64], index: 14, kind: input, shape index: {}]   ;;  %s3289_s15 = inlined_call_operand.vmem [shape: f32[1,64], index: 15, kind: input, shape index: {}]   ;;  %s3290_s16 = inlined_call_operand.vmem [shape: f32[64,32], index: 16, kind: input, shape index: {}]   ;;  %s3291_s17 = inlined_call_operand.vmem [shape: f32[1,32], index: 17, kind: input, shape index: {}]   ;;  %s3292_s18 = inlined_call_operand.hbm [shape: f32[16,32], index: 18, kind: output, shape index: {}]  }
   0x1   :  { %3296 = sst [smem:[#allocation5_spill]] %s3274_s0 }
   0x2   :  { %3297 = sst [smem:[#allocation6_spill]] %s3275_s1 }
   0x3   :  { %3298 = sst [smem:[#allocation7_spill]] %s3276_s2 }
   0x4   :  { %v68_v0 = vld [vmem:[%s3279_s5] sm:$0xff]  ;;  %s3299_s0 = sld [smem:[#allocation5_spill]]  ;;  %vm69_vm0 = vcmask 64512   ;;  %s3300_s23 = sld [smem:[#allocation6_spill]] }
   0x5   :  { %v207_v2 = vld [vmem:[%s3280_s6] sm:$0xff]  ;;  %2575 = vmatprep.subr.mxu0 %v68_v0 }
   0x6   :  { %2576 = vmatpush3.msra.mxu0 %v68_v0  ;;  %2771 = vmatprep.subr.mxu1 %v207_v2  ;;  %v345_v11 = vld [vmem:[%s3281_s7] sm:$0xff] }
   0x7   :  { %2772 = vmatpush3.msra.mxu1 %v207_v2  ;;  %2589 = vmatprep.subr.mxu0 %v207_v2 }
   0xa   :  { %v60_v1 = vld [vmem:[%s3299_s0] sm:$0xff]  ;;  %v61_v3 = vld [vmem:[%s3299_s0 + $0x8] sm:$0xff]  ;;  %v201_v4 = vld [vmem:[%s3300_s23 + $0x10] sm:$0xff] }
   0xb   :  { %2577 = vmatprep.mubr.msk.f32.mxu0 %vm69_vm0, %v60_v1  ;;  %v202_v5 = vld [vmem:[%s3300_s23 + $0x18] sm:$0xff]  ;;  %v62_v6 = vld [vmem:[%s3299_s0 + $0x10] sm:$0xff]  ;;  %v203_v7 = vld [vmem:[%s3300_s23 + $0x20] sm:$0xff]  ;;  %2594 = vmatprep.mubr.msk.f32.mxu1 %vm69_vm0, %v201_v4 }
   0xc   :  { %2578 = vmatmul.mubr.msk.f32.vlgmr.msra.gmra.mrb[0].mxu0 %vm69_vm0, %v61_v3  ;;  %v63_v8 = vld [vmem:[%s3299_s0 + $0x18] sm:$0xff]  ;;  %2595 = vmatmul.mubr.msk.f32.vlgmr.msra.gmra.mrb[0].mxu1 %vm69_vm0, %v202_v5  ;;  %v64_v9 = vld [vmem:[%s3299_s0 + $0x20] sm:$0xff]  ;;  %v204_v10 = vld [vmem:[%s3300_s23 + $0x28] sm:$0xff] }
   0xd   :  { %2580 = vmatprep.mubr.msk.f32.mxu0 %vm69_vm0, %v62_v6  ;;  %2597 = vmatprep.mubr.msk.f32.mxu1 %vm69_vm0, %v203_v7  ;;  %v205_v12 = vld [vmem:[%s3300_s23 + $0x30] sm:$0xff] }
   0xe   :  { %2590 = vmatpush3.msra.mxu0 %v207_v2 }
   0xf   :  { %2603 = vmatprep.subr.mxu0 %v345_v11 }
  0x10   :  { %2581 = vmatmul.mubr.msk.f32.gmra.mrb[2].mxu0 %vm69_vm0, %v63_v8 }
  0x11   :  { %23 = vsyncpa [#allocation3], 0  ;;  %2583 = vmatprep.mubr.msk.f32.mxu0 %vm69_vm0, %v64_v9  ;;  %v65_v13 = vld [vmem:[%s3299_s0 + $0x28] sm:$0xff]  ;;  %2598 = vmatmul.mubr.msk.f32.gmra.mrb[2].mxu1 %vm69_vm0, %v204_v10  ;;  %v66_v14 = vld [vmem:[%s3299_s0 + $0x30] sm:$0xff]  ;;  %s3301_s2 = sld [smem:[#allocation7_spill]]  ;;  %v2848_v27 = vmov 0.0  }
  0x12   :  { %2600 = vmatprep.mubr.msk.f32.mxu1 %vm69_vm0, %v205_v12  ;;  %v206_v15 = vld [vmem:[%s3300_s23 + $0x38] sm:$0xff]  ;;  %v199_v17 = vld [vmem:[%s3300_s23] sm:$0xff]  ;;  %v200_v18 = vld [vmem:[%s3300_s23 + $0x8] sm:$0xff]  ;;  %2617 = vmatprep.subr.mxu1 %v2848_v27  ;;  %vm2849_vm1 = vmmov 0   ;;  %vm2119_vm4 = vcmask 261120   ;;  %vm2272_vm5 = vcmask 523264  }
  0x13   :  { %v67_v16 = vld [vmem:[%s3299_s0 + $0x38] sm:$0xff]  ;;  %v1083_v54 = vld [vmem:[%s3278_s4] sm:$0xff]  ;;  %v1084_v4 = vld [vmem:[%s3278_s4 + $0x8] sm:$0xff]  ;;  %s2850_s4 = smov [#allocation2]  }
  0x14   :  { %2584 = vmatmul.mubr.msk.f32.gmra.mrb[4].mxu0 %vm69_vm0, %v65_v13  ;;  %vm1085_vm2 = vcmp.eq.s32.totalorder %v1083_v54, 0  ;;  %vm1086_vm3 = vcmp.eq.s32.totalorder %v1084_v4, 0  ;;  %s2407_s0 = sshll.u32 %s2850_s4, 4  ;;  %s2408_s0 = int_to_ptr.vmem [resolvable:$true] %s2407_s0 }
  0x15   :  { %2586 = vmatprep.mubr.msk.f32.mxu0 %vm69_vm0, %v66_v14  ;;  %2601 = vmatmul.mubr.msk.f32.gmra.mrb[4].mxu1 %vm69_vm0, %v206_v15  ;;  %v1087_v57 = vsel %vm1085_vm2, -1e+30, %v2848_v27  ;;  %v1088_v10 = vsel %vm1086_vm3, -1e+30, %v2848_v27  ;;  %s2824_s5 = scalar_lea.vmem %s2408_s0, 256  ;;  %p2829_p1 = scmp.lt.s32.totalorder %s2408_s0, %s2408_s0 }
  0x16   :  { %2619 = vmatprep.mubr.msk.f32.mxu1 %vm2849_vm1, %v2848_v27  ;;  %p2825_p0 = scmp.ne.s32.totalorder %s2408_s0, %s2824_s5  ;;  %p2830_p2 = scmp.lt.s32.totalorder %s2824_s5, %s2824_s5 }
  0x17   :  { %v337_v19 = vld [vmem:[%s3301_s2] sm:$0xff]  ;;  %v338_v20 = vld [vmem:[%s3301_s2 + $0x8] sm:$0xff]  ;;  %v339_v21 = vld [vmem:[%s3301_s2 + $0x10] sm:$0xff] }
  0x18   :  { %2587 = vmatmul.mubr.msk.f32.gmra.mrb[6].mxu0 %vm69_vm0, %v67_v16  ;;  %v340_v22 = vld [vmem:[%s3301_s2 + $0x18] sm:$0xff]  ;;  %v341_v23 = vld [vmem:[%s3301_s2 + $0x20] sm:$0xff]  ;;  %v342_v24 = vld [vmem:[%s3301_s2 + $0x28] sm:$0xff]  ;;  %p2831_p3 = por %p2830_p2, %p2829_p1 }
  0x19   :  { %2591 = vmatprep.mubr.msk.f32.mxu0 %vm69_vm0, %v199_v17  ;;  %v343_v25 = vld [vmem:[%s3301_s2 + $0x30] sm:$0xff]  ;;  %v344_v26 = vld [vmem:[%s3301_s2 + $0x38] sm:$0xff] }
  0x1a   :  { %p2832_p4 = pnand %p2831_p3, %p2825_p0 }
  0x1c   :  { %2592 = vmatmul.mubr.msk.f32.vlgmr.msra.gmra.mrb[8].mxu0 %vm69_vm0, %v200_v18 }
  0x1d   :  { %2604 = vmatpush3.msra.mxu0 %v345_v11  ;;  %2605 = vmatprep.mubr.msk.f32.mxu0 %vm69_vm0, %v337_v19 }
  0x1e   :  { %2637 = vmatprep.subr.mxu0 %v2848_v27 }
  0x20   :  { %2606 = vmatmul.mubr.msk.f32.vlgmr.msra.gmra.mrb[10].mxu0 %vm69_vm0, %v338_v20 }
  0x21   :  { %2608 = vmatprep.mubr.msk.f32.mxu0 %vm69_vm0, %v339_v21 }
  0x24   :  { %2609 = vmatmul.mubr.msk.f32.gmra.mrb[12].mxu0 %vm69_vm0, %v340_v22 }
  0x25   :  { %2611 = vmatprep.mubr.msk.f32.mxu0 %vm69_vm0, %v341_v23 }
  0x28   :  { %2612 = vmatmul.mubr.msk.f32.gmra.mrb[14].mxu0 %vm69_vm0, %v342_v24 }
  0x29   :  { %2614 = vmatprep.mubr.msk.f32.mxu0 %vm69_vm0, %v343_v25 }
  0x2c   :  { %2615 = vmatmul.mubr.msk.f32.gmra.mrb[16].mxu0 %vm69_vm0, %v344_v26 }
  0x2d   :  { %2639 = vmatprep.mubr.msk.f32.mxu0 %vm2849_vm1, %v2848_v27 }
  0xdf   :  { %v2579_v28 = vpop.f32.mrb[0].mxu0  ;;  %v2596_v30 = vpop.f32.mrb[0].mxu1 }
  0xe0   :  { %v160_v29 = vpop.f32.mrb[1].mxu0  ;;  %v308_v31 = vpop.f32.mrb[1].mxu1 }
  0xe3   :  { %v2582_v32 = vpop.f32.mrb[2].mxu0 }
  0xe4   :  { %v170_v33 = vpop.f32.mrb[3].mxu0  ;;  %v2599_v34 = vpop.f32.mrb[2].mxu1 }
  0xe5   :  { %v318_v35 = vpop.f32.mrb[3].mxu1 }
  0xe6   :  { %2638 = vmatpush3.xpose.msk.msra.mxu0 %vm69_vm0, %v318_v35 }
  0xe7   :  { %v2585_v36 = vpop.f32.mrb[4].mxu0  ;;  %2647 = vmatprep.subr.mxu0 %v2848_v27 }
  0xe8   :  { %v180_v37 = vpop.f32.mrb[5].mxu0  ;;  %v2602_v38 = vpop.f32.mrb[4].mxu1 }
  0xe9   :  { %v328_v39 = vpop.f32.mrb[5].mxu1  ;;  %2640 = vmatmul.mubr.msk.f32.vlgmr.msra.gmra.mrb[18].mxu0 %vm69_vm0, %v180_v37 }
  0xea   :  { %2648 = vmatpush3.xpose.msk.msra.mxu0 %vm69_vm0, %v328_v39  ;;  %2649 = vmatprep.mubr.msk.f32.mxu0 %vm2849_vm1, %v2848_v27 }
  0xeb   :  { %v2588_v40 = vpop.f32.mrb[6].mxu0  ;;  %2657 = vmatprep.subr.mxu0 %v2848_v27 }
  0xec   :  { %v190_v41 = vpop.f32.mrb[7].mxu0 }
  0xed   :  { %2650 = vmatmul.mubr.msk.f32.vlgmr.msra.gmra.mrb[20].mxu0 %vm69_vm0, %v190_v41 }
  0xee   :  { %2659 = vmatprep.mubr.msk.f32.mxu0 %vm2849_vm1, %v2848_v27 }
  0xef   :  { %v2593_v42 = vpop.f32.mrb[8].mxu0 }
  0xf0   :  { %v298_v43 = vpop.f32.mrb[9].mxu0 }
  0xf1   :  { %2618 = vmatpush3.xpose.msk.msra.mxu1 %vm69_vm0, %v298_v43 }
  0xf2   :  { %2622 = vmatprep.subr.mxu1 %v2848_v27 }
  0xf3   :  { %v2607_v44 = vpop.f32.mrb[10].mxu0 }
  0xf4   :  { %2620 = vmatmul.mubr.msk.f32.vlgmr.msra.gmra.mrb[6].mxu1 %vm69_vm0, %v160_v29  ;;  %v436_v45 = vpop.f32.mrb[11].mxu0 }
  0xf5   :  { %2623 = vmatpush3.xpose.msk.msra.mxu1 %vm69_vm0, %v2593_v42  ;;  %2624 = vmatprep.mubr.msk.f32.mxu1 %vm2849_vm1, %v2848_v27 }
  0xf6   :  { %2627 = vmatprep.subr.mxu1 %v2848_v27  ;;  %2658 = vmatpush3.msra.mxu0 %v436_v45 }
  0xf7   :  { %v3076_v46 = vpop.f32.mrb[12].mxu0  ;;  %2667 = vmatprep.subr.mxu0 %v2848_v27 }
  0xf8   :  { %2625 = vmatmul.mubr.msk.f32.vlgmr.msra.gmra.mrb[8].mxu1 %vm69_vm0, %v2579_v28  ;;  %v3080_v47 = vpop.f32.mrb[13].mxu0 }
  0xf9   :  { %2628 = vmatpush3.xpose.msk.msra.mxu1 %vm69_vm0, %v308_v31  ;;  %2629 = vmatprep.mubr.msk.f32.mxu1 %vm2849_vm1, %v2848_v27 }
  0xfa   :  { %2632 = vmatprep.subr.mxu1 %v2848_v27 }
  0xfb   :  { %v3105_v48 = vpop.f32.mrb[14].mxu0 }
  0xfc   :  { %2630 = vmatmul.mubr.msk.f32.vlgmr.msra.gmra.mrb[10].mxu1 %vm69_vm0, %v170_v33  ;;  %v3107_v49 = vpop.f32.mrb[15].mxu0 }
  0xfd   :  { %2633 = vmatpush3.xpose.msk.msra.mxu1 %vm69_vm0, %v2596_v30  ;;  %2634 = vmatprep.mubr.msk.f32.mxu1 %vm2849_vm1, %v2848_v27 }
  0xfe   :  { %2642 = vmatprep.subr.mxu1 %v2848_v27 }
  0xff   :  { %v3109_v50 = vpop.f32.mrb[16].mxu0 }
 0x100   :  { %2635 = vmatmul.mubr.msk.f32.vlgmr.msra.gmra.mrb[12].mxu1 %vm69_vm0, %v2582_v32  ;;  %v3111_v51 = vpop.f32.mrb[17].mxu0 }
 0x101   :  { %2643 = vmatpush3.xpose.msk.msra.mxu1 %vm69_vm0, %v2599_v34  ;;  %2644 = vmatprep.mubr.msk.f32.mxu1 %vm2849_vm1, %v2848_v27 }
 0x102   :  { %2652 = vmatprep.subr.mxu1 %v2848_v27 }
 0x104   :  { %2645 = vmatmul.mubr.msk.f32.vlgmr.msra.gmra.mrb[14].mxu1 %vm69_vm0, %v2585_v36 }
 0x105   :  { %2653 = vmatpush3.xpose.msk.msra.mxu1 %vm69_vm0, %v2602_v38  ;;  %2654 = vmatprep.mubr.msk.f32.mxu1 %vm2849_vm1, %v2848_v27 }
 0x106   :  { %2662 = vmatprep.subr.mxu1 %v2848_v27 }
 0x108   :  { %2655 = vmatmul.mubr.msk.f32.vlgmr.msra.gmra.mrb[16].mxu1 %vm69_vm0, %v2588_v40 }
 0x109   :  { %2663 = vmatpush3.msra.mxu1 %v2607_v44  ;;  %2664 = vmatprep.mubr.msk.f32.mxu1 %vm2849_vm1, %v2848_v27 }
 0x10a   :  { %2672 = vmatprep.subr.mxu1 %v2848_v27 }
 0x1bc   :  { %v851_v52 = vpop.f32.mrb[18].mxu0 }
 0x1bd   :  { %v2641_v53 = vpop.f32.mrb[19].mxu0  ;;  %v1093_v14 = vadd.f32 %v1088_v10, %v851_v52 }
 0x1bf   :  { %v1109_v21 = vsel %vm69_vm0, %v1093_v14, -inf }
 0x1c0   :  { %v1003_v55 = vpop.f32.mrb[20].mxu0 }
 0x1c1   :  { %v2651_v56 = vpop.f32.mrb[21].mxu0  ;;  %v1095_v15 = vadd.f32 %v1088_v10, %v1003_v55 }
 0x1c3   :  { %v1115_v22 = vsel %vm69_vm0, %v1095_v15, -inf }
 0x1c7   :  { %v547_v58 = vpop.f32.mrb[6].mxu1 }
 0x1c8   :  { %v1089_v59 = vadd.f32 %v1087_v57, %v547_v58  ;;  %v2621_v60 = vpop.f32.mrb[7].mxu1 }
 0x1ca   :  { %v1097_v61 = vsel %vm69_vm0, %v1089_v59, -inf }
 0x1cb   :  { %1098 = vmax.xlane.f32.xlu1 %v1097_v61  ;;  %v623_v62 = vpop.f32.mrb[8].mxu1 }
 0x1cc   :  { %v1090_v63 = vadd.f32 %v1087_v57, %v623_v62  ;;  %v2626_v0 = vpop.f32.mrb[9].mxu1 }
 0x1ce   :  { %v1100_v1 = vsel %vm69_vm0, %v1090_v63, -inf }
 0x1cf   :  { %1101 = vmax.xlane.f32.xlu0 %v1100_v1  ;;  %v699_v2 = vpop.f32.mrb[10].mxu1 }
 0x1d0   :  { %v2631_v3 = vpop.f32.mrb[11].mxu1  ;;  %v1091_v8 = vadd.f32 %v1087_v57, %v699_v2 }
 0x1d2   :  { %v1103_v16 = vsel %vm69_vm0, %v1091_v8, -inf }
 0x1d3   :  { %v775_v5 = vpop.f32.mrb[12].mxu1 }
 0x1d4   :  { %v1092_v6 = vadd.f32 %v1087_v57, %v775_v5  ;;  %v2636_v7 = vpop.f32.mrb[13].mxu1 }
 0x1d6   :  { %v1106_v9 = vsel %vm69_vm0, %v1092_v6, -inf }
 0x1d7   :  { %1107 = vmax.xlane.f32.xlu0 %v1106_v9  ;;  %v927_v11 = vpop.f32.mrb[14].mxu1 }
 0x1d8   :  { %v1094_v12 = vadd.f32 %v1088_v10, %v927_v11  ;;  %v2646_v13 = vpop.f32.mrb[15].mxu1 }
 0x1da   :  { %v1112_v17 = vsel %vm69_vm0, %v1094_v12, -inf }
 0x1db   :  { %1104 = vmax.xlane.f32.xlu0 %v1103_v16  ;;  %1113 = vmax.xlane.f32.xlu1 %v1112_v17  ;;  %v1079_v18 = vpop.f32.mrb[16].mxu1 }
 0x1dc   :  { %v2656_v19 = vpop.f32.mrb[17].mxu1  ;;  %v1096_v20 = vadd.f32 %v1088_v10, %v1079_v18 }
 0x1de   :  { %v1118_v23 = vsel %vm69_vm0, %v1096_v20, -inf }
 0x1df   :  { %1110 = vmax.xlane.f32.xlu1 %v1109_v21  ;;  %1116 = vmax.xlane.f32.xlu0 %v1115_v22 }
 0x1e3   :  { %1119 = vmax.xlane.f32.xlu1 %v1118_v23 }
 0x258   :  { %v1099_v24 = vpop.xlane.xlu1 %1098 }
 0x259   :  { %v1121_v25 = vsub.f32 %v1089_v59, %v1099_v24 }
 0x25b   :  { %v1129_v29 = vmul.f32 1.442695, %v1121_v25 }
 0x25c   :  { %v1102_v26 = vpop.xlane.xlu0 %1101 }
 0x25d   :  { %v1122_v28 = vsub.f32 %v1090_v63, %v1102_v26  ;;  %v2466_v26 = vld [vmem:[%s3282_s8 + $0x8] sm:$0xff] }
 0x25f   :  { %v1131_v30 = vmul.f32 1.442695, %v1122_v28  ;;  %v1769_v28 = vld [vmem:[%s3282_s8] sm:$0xff] }
 0x261   :  { %2784 = vpow2.f32 %v1131_v30 }
 0x262   :  { %2786 = vpow2.f32 %v1129_v29 }
 0x264   :  { %v1108_v31 = vpop.xlane.xlu0 %1107 }
 0x265   :  { %v1124_v32 = vsub.f32 %v1092_v6, %v1108_v31 }
 0x267   :  { %v1135_v33 = vmul.f32 1.442695, %v1124_v32 }
 0x268   :  { %v1105_v34 = vpop.xlane.xlu0 %1104  ;;  %v1114_v35 = vpop.xlane.xlu1 %1113 }
 0x269   :  { %2788 = vpow2.f32 %v1135_v33  ;;  %v1123_v36 = vsub.f32 %v1091_v8, %v1105_v34  ;;  %v1126_v37 = vsub.f32 %v1094_v12, %v1114_v35 }
 0x26b   :  { %v2785_v38 = vpop.eup %2784  ;;  %v1133_v39 = vmul.f32 1.442695, %v1123_v36  ;;  %v1139_v40 = vmul.f32 1.442695, %v1126_v37  ;;  %v2471_v36 = vld [vmem:[%s3282_s8 + $0x10] sm:$0xff] }
 0x26c   :  { %v1111_v41 = vpop.xlane.xlu1 %1110  ;;  %v1117_v42 = vpop.xlane.xlu0 %1116  ;;  %v1148_v43 = vsel %vm69_vm0, %v2785_v38, 0.0 }
 0x26d   :  { %v2787_v44 = vpop.eup %2786  ;;  %2790 = vpow2.f32 %v1133_v39  ;;  %v1125_v45 = vsub.f32 %v1093_v14, %v1111_v41  ;;  %v1127_v52 = vsub.f32 %v1095_v15, %v1117_v42  ;;  %1149 = vadd.xlane.f32.xlu0 %v1148_v43  ;;  %v2474_v42 = vld [vmem:[%s3282_s8 + $0x18] sm:$0xff] }
 0x26e   :  { %2792 = vpow2.f32 %v1139_v40  ;;  %v1145_v56 = vsel %vm69_vm0, %v2787_v44, 0.0 }
 0x26f   :  { %v1137_v53 = vmul.f32 1.442695, %v1125_v45  ;;  %v1141_v54 = vmul.f32 1.442695, %v1127_v52  ;;  %v2477_v45 = vld [vmem:[%s3283_s9] ss:$0 sm:$0xff] }
 0x270   :  { %v1120_v55 = vpop.xlane.xlu1 %1119 }
 0x271   :  { %2794 = vpow2.f32 %v1137_v53  ;;  %v1128_v57 = vsub.f32 %v1096_v20, %v1120_v55  ;;  %1146 = vadd.xlane.f32.xlu0 %v1145_v56  ;;  %v2114_v53 = vld [vmem:[%s3277_s3 + $0x8] sm:$0xff]  ;;  %v2113_v56 = vld [vmem:[%s3277_s3] sm:$0xff] }
 0x272   :  { %2796 = vpow2.f32 %v1141_v54 }
 0x273   :  { %v2789_v58 = vpop.eup %2788  ;;  %v1143_v59 = vmul.f32 1.442695, %v1128_v57 }
 0x274   :  { %v1154_v60 = vsel %vm69_vm0, %v2789_v58, 0.0 }
 0x275   :  { %2798 = vpow2.f32 %v1143_v59  ;;  %1155 = vadd.xlane.f32.xlu1 %v1154_v60 }
 0x277   :  { %v2791_v61 = vpop.eup %2790 }
 0x278   :  { %v2793_v62 = vpop.eup %2792  ;;  %v1151_v63 = vsel %vm69_vm0, %v2791_v61, 0.0 }
 0x279   :  { %v1160_v0 = vsel %vm69_vm0, %v2793_v62, 0.0  ;;  %1152 = vadd.xlane.f32.xlu0 %v1151_v63 }
 0x27a   :  { %1161 = vadd.xlane.f32.xlu1 %v1160_v0 }
 0x27b   :  { %v2795_v1 = vpop.eup %2794 }
 0x27c   :  { %v2797_v2 = vpop.eup %2796  ;;  %v1157_v3 = vsel %vm69_vm0, %v2795_v1, 0.0 }
 0x27d   :  { %v1163_v4 = vsel %vm69_vm0, %v2797_v2, 0.0 }
 0x27e   :  { %1158 = vadd.xlane.f32.xlu1 %v1157_v3  ;;  %1164 = vadd.xlane.f32.xlu0 %v1163_v4 }
 0x27f   :  { %v2799_v5 = vpop.eup %2798 }
 0x280   :  { %v1166_v6 = vsel %vm69_vm0, %v2799_v5, 0.0 }
 0x282   :  { %1167 = vadd.xlane.f32.xlu1 %v1166_v6 }
 0x2fa   :  { %v1150_v7 = vpop.xlane.xlu0 %1149 }
 0x2fb   :  { %2800 = vrcp.f32 %v1150_v7 }
 0x2fe   :  { %v1147_v8 = vpop.xlane.xlu0 %1146 }
 0x2ff   :  { %2802 = vrcp.f32 %v1147_v8  ;;  %v2163_v8 = vld [vmem:[%s3288_s14] sm:$0xff] }
 0x302   :  { %v1156_v9 = vpop.xlane.xlu1 %1155 }
 0x303   :  { %2804 = vrcp.f32 %v1156_v9  ;;  %v2164_v9 = vld [vmem:[%s3288_s14 + $0x8] sm:$0xff] }
 0x305   :  { %v2801_v10 = vpop.eup %2800 }
 0x306   :  { %v1178_v11 = vmul.f32 %v2801_v10, %v2785_v38  ;;  %v1153_v12 = vpop.xlane.xlu0 %1152  ;;  %v2747_v10 = vpack.c.bf16 %v2164_v9, %v2163_v8 }
 0x307   :  { %v1162_v13 = vpop.xlane.xlu1 %1161  ;;  %2806 = vrcp.f32 %v1153_v12  ;;  %v2166_v12 = vld [vmem:[%s3288_s14 + $0x18] sm:$0xff] }
 0x308   :  { %2808 = vrcp.f32 %v1162_v13  ;;  %2665 = vmatmul.mubr.msk.f32.vlgmr.msra.gmra.mrb[18].mxu1 %vm69_vm0, %v1178_v11  ;;  %v2165_v11 = vld [vmem:[%s3288_s14 + $0x10] sm:$0xff] }
 0x309   :  { %v2803_v14 = vpop.eup %2802  ;;  %2673 = vmatpush3.msra.mxu1 %v3076_v46  ;;  %2674 = vmatprep.mubr.msk.f32.mxu1 %vm2849_vm1, %v2848_v27  ;;  %v2751_v13 = vpack.c.bf16 %v2166_v12, %v2165_v11  ;;  %v2486_v11 = vld [vmem:[%s3286_s12] ss:$0 sm:$0xff] }
 0x30a   :  { %v1177_v15 = vmul.f32 %v2803_v14, %v2787_v44  ;;  %2682 = vmatprep.subr.mxu1 %v2848_v27  ;;  %v2257_v14 = vld [vmem:[%s3290_s16] sm:$0xff] }
 0x30b   :  { %v1159_v16 = vpop.xlane.xlu1 %1158  ;;  %v1165_v17 = vpop.xlane.xlu0 %1164 }
 0x30c   :  { %2810 = vrcp.f32 %v1159_v16  ;;  %2660 = vmatmul.mubr.msk.f32.vlgmr.msra.gmra.mrb[22].mxu0 %vm69_vm0, %v1177_v15  ;;  %v2258_v15 = vld [vmem:[%s3290_s16 + $0x8] sm:$0xff] }
 0x30d   :  { %v2805_v18 = vpop.eup %2804  ;;  %2668 = vmatpush3.msra.mxu0 %v3080_v47  ;;  %2669 = vmatprep.mubr.msk.f32.mxu0 %vm2849_vm1, %v2848_v27  ;;  %2812 = vrcp.f32 %v1165_v17  ;;  %v2755_v16 = vpack.c.bf16 %v2258_v15, %v2257_v14  ;;  %v2487_v15 = vld [vmem:[%s3287_s13] ss:$0 sm:$0xff] }
 0x30e   :  { %v1180_v19 = vmul.f32 %v2805_v18, %v2789_v58  ;;  %2677 = vmatprep.subr.mxu0 %v2848_v27 }
 0x30f   :  { %v1168_v46 = vpop.xlane.xlu1 %1167 }
 0x310   :  { %2814 = vrcp.f32 %v1168_v46  ;;  %2675 = vmatmul.mubr.msk.f32.vlgmr.msra.gmra.mrb[20].mxu1 %vm69_vm0, %v1180_v19 }
 0x311   :  { %v2807_v20 = vpop.eup %2806  ;;  %2683 = vmatpush3.msra.mxu1 %v3105_v48  ;;  %2684 = vmatprep.mubr.msk.f32.mxu1 %vm2849_vm1, %v2848_v27 }
 0x312   :  { %v2809_v21 = vpop.eup %2808  ;;  %v1179_v22 = vmul.f32 %v2807_v20, %v2791_v61  ;;  %2692 = vmatprep.subr.mxu1 %v2848_v27 }
 0x313   :  { %v1182_v47 = vmul.f32 %v2809_v21, %v2793_v62 }
 0x314   :  { %2670 = vmatmul.mubr.msk.f32.vlgmr.msra.gmra.mrb[24].mxu0 %vm69_vm0, %v1179_v22 }
 0x315   :  { %2678 = vmatpush3.msra.mxu0 %v3107_v49  ;;  %2685 = vmatmul.mubr.msk.f32.vlgmr.msra.gmra.mrb[22].mxu1 %vm69_vm0, %v1182_v47  ;;  %v2478_v47 = vld [vmem:[%s3284_s10] ss:$0 sm:$0xff] }
 0x316   :  { %v2811_v23 = vpop.eup %2810  ;;  %2693 = vmatpush3.msra.mxu1 %v3109_v50  ;;  %2679 = vmatprep.mubr.msk.f32.mxu0 %vm2849_vm1, %v2848_v27 }
 0x317   :  { %v1181_v48 = vmul.f32 %v2811_v23, %v2795_v1  ;;  %2687 = vmatprep.subr.mxu0 %v2848_v27  ;;  %2694 = vmatprep.mubr.msk.f32.mxu1 %vm2849_vm1, %v2848_v27  ;;  %v2813_v24 = vpop.eup %2812 }
 0x318   :  { %v1183_v49 = vmul.f32 %v2813_v24, %v2797_v2  ;;  %2748 = vmatprep.subr.bf16.mxu1 %v2747_v10 }
 0x319   :  { %2680 = vmatmul.mubr.msk.f32.vlgmr.msra.gmra.mrb[26].mxu0 %vm69_vm0, %v1181_v48 }
 0x31a   :  { %v2815_v25 = vpop.eup %2814  ;;  %2688 = vmatpush3.msra.mxu0 %v3111_v51  ;;  %2689 = vmatprep.mubr.msk.f32.mxu0 %vm2849_vm1, %v2848_v27 }
 0x31b   :  { %v1184_v50 = vmul.f32 %v2815_v25, %v2799_v5  ;;  %2697 = vmatprep.subr.mxu0 %v2466_v26  ;;  %v2479_v25 = vld [vmem:[%s3285_s11] ss:$0 sm:$0xff] }
 0x31d   :  { %2690 = vmatmul.mubr.msk.f32.vlgmr.msra.gmra.mrb[28].mxu0 %vm69_vm0, %v1183_v49  ;;  %2695 = vmatmul.mubr.msk.f32.vlgmr.msra.gmra.mrb[24].mxu1 %vm69_vm0, %v1184_v50 }
 0x31e   :  { %2698 = vmatpush3.msra.mxu0 %v2466_v26  ;;  %2750 = vmatpush3.bf16.msra.mxu1 %v2747_v10  ;;  %v2259_v26 = vld [vmem:[%s3290_s16 + $0x10] sm:$0xff] }
 0x31f   :  { %2702 = vmatprep.subr.mxu0 %v1769_v28  ;;  %2752 = vmatprep.subr.bf16.mxu1 %v2751_v13 }
 0x322   :  { %2754 = vmatpush3.bf16.msra.mxu1 %v2751_v13 }
 0x323   :  { %2756 = vmatprep.subr.bf16.mxu1 %v2755_v16 }
 0x3db   :  { %v1327_v51 = vpop.f32.mrb[18].mxu1 }
 0x3dc   :  { %v2666_v29 = vpop.f32.mrb[19].mxu1  ;;  %2699 = vmatprep.mubr.msk.f32.mxu0 %vm69_vm0, %v1327_v51 }
 0x3df   :  { %v1254_v27 = vpop.f32.mrb[22].mxu0 }
 0x3e0   :  { %v2661_v30 = vpop.f32.mrb[23].mxu0 }
 0x3e1   :  { %v2261_v30 = vld [vmem:[%s3290_s16 + $0x20] sm:$0xff] }
 0x3e3   :  { %v1473_v31 = vpop.f32.mrb[20].mxu1 }
 0x3e4   :  { %v2676_v32 = vpop.f32.mrb[21].mxu1 }
 0x3e7   :  { %v1400_v33 = vpop.f32.mrb[24].mxu0 }
 0x3e8   :  { %v1619_v34 = vpop.f32.mrb[22].mxu1  ;;  %v2671_v35 = vpop.f32.mrb[25].mxu0 }
 0x3e9   :  { %v2686_v37 = vpop.f32.mrb[23].mxu1  ;;  %2700 = vmatmul.mubr.msk.f32.vlgmr.msra.gmra.mrb[30].mxu0 %vm69_vm0, %v1619_v34  ;;  %v2264_v34 = vld [vmem:[%s3290_s16 + $0x38] sm:$0xff] }
 0x3ea   :  { %2704 = vmatprep.mubr.msk.f32.mxu0 %vm69_vm0, %v1254_v27  ;;  %2703 = vmatpush3.msra.mxu0 %v1769_v28  ;;  %v2260_v28 = vld [vmem:[%s3290_s16 + $0x18] sm:$0xff] }
 0x3eb   :  { %2707 = vmatprep.subr.mxu0 %v2471_v36  ;;  %v2759_v27 = vpack.c.bf16 %v2260_v28, %v2259_v26 }
 0x3ec   :  { %v1546_v38 = vpop.f32.mrb[26].mxu0 }
 0x3ed   :  { %v2681_v39 = vpop.f32.mrb[27].mxu0 }
 0x3f0   :  { %v1692_v40 = vpop.f32.mrb[28].mxu0  ;;  %v1765_v41 = vpop.f32.mrb[24].mxu1 }
 0x3f1   :  { %v2691_v43 = vpop.f32.mrb[29].mxu0  ;;  %v2696_v44 = vpop.f32.mrb[25].mxu1  ;;  %2705 = vmatmul.mubr.msk.f32.vlgmr.msra.gmra.mrb[30].mxu0 %vm69_vm0, %v1546_v38 }
 0x3f2   :  { %2709 = vmatprep.mubr.msk.f32.mxu0 %vm69_vm0, %v1400_v33  ;;  %2708 = vmatpush3.msra.mxu0 %v2471_v36  ;;  %v2263_v33 = vld [vmem:[%s3290_s16 + $0x30] sm:$0xff]  ;;  %v2480_v36 = vld [vmem:[%s3289_s15] ss:$0 sm:$0xff] }
 0x3f3   :  { %2712 = vmatprep.subr.mxu0 %v2474_v42  ;;  %v2767_v35 = vpack.c.bf16 %v2264_v34, %v2263_v33  ;;  %v2483_v43 = vld [vmem:[%s3291_s17] ss:$0 sm:$0xff] }
 0x3f9   :  { %2710 = vmatmul.mubr.msk.f32.vlgmr.msra.gmra.mrb[30].mxu0 %vm69_vm0, %v1692_v40 }
 0x3fa   :  { %2714 = vmatprep.mubr.msk.f32.mxu0 %vm69_vm0, %v1473_v31  ;;  %2713 = vmatpush3.msra.mxu0 %v2474_v42  ;;  %v2262_v31 = vld [vmem:[%s3290_s16 + $0x28] sm:$0xff] }
 0x3fb   :  { %v2763_v32 = vpack.c.bf16 %v2262_v31, %v2261_v30 }
 0x401   :  { %2715 = vmatmul.mubr.msk.f32.vlgmr.msra.gmra.mrb[30].mxu0 %vm69_vm0, %v1765_v41 }
 0x4d4   :  { %v2716_v52 = vpop.f32.mrb[30].mxu0 }
 0x4d5   :  { %v2112_v54 = vadd.f32 %v2716_v52, %v2477_v45  ;;  %v2093_v55 = vpop.f32.mrb[31].mxu0 }
 0x4d6   :  { %v2111_v57 = vadd.f32 %v2477_v45, %v2093_v55 }
 0x4d7   :  { %v2116_v58 = vadd.f32 %v2114_v53, %v2112_v54 }
 0x4d8   :  { %v2115_v59 = vadd.f32 %v2113_v56, %v2111_v57 }
 0x4d9   :  { %v2123_v60 = vsel %vm2119_vm4, %v2116_v58, 0.0 }
 0x4da   :  { %2124 = vadd.xlane.f32.xlu1 %v2123_v60  ;;  %v2120_v61 = vsel %vm2119_vm4, %v2115_v59, 0.0 }
 0x4db   :  { %2121 = vadd.xlane.f32.xlu0 %v2120_v61 }
 0x567   :  { %v2125_v62 = vpop.xlane.xlu1 %2124 }
 0x568   :  { %v2128_v63 = vmul.f32 0.03125, %v2125_v62  ;;  %v2122_v0 = vpop.xlane.xlu0 %2121 }
 0x569   :  { %v2127_v1 = vmul.f32 0.03125, %v2122_v0 }
 0x56a   :  { %v2130_v2 = vsub.f32 %v2116_v58, %v2128_v63 }
 0x56b   :  { %v2129_v3 = vsub.f32 %v2115_v59, %v2127_v1 }
 0x56c   :  { %v2132_v4 = vmul.f32 %v2130_v2, %v2130_v2 }
 0x56d   :  { %v2131_v5 = vmul.f32 %v2129_v3, %v2129_v3 }
 0x56e   :  { %v2136_v6 = vsel %vm2119_vm4, %v2132_v4, 0.0 }
 0x56f   :  { %2137 = vadd.xlane.f32.xlu1 %v2136_v6  ;;  %v2133_v7 = vsel %vm2119_vm4, %v2131_v5, 0.0 }
 0x570   :  { %2134 = vadd.xlane.f32.xlu0 %v2133_v7 }
 0x5fc   :  { %v2138_v17 = vpop.xlane.xlu1 %2137 }
 0x5fd   :  { %v2140_v18 = vmul.f32 0.03125, %v2138_v17  ;;  %v2135_v19 = vpop.xlane.xlu0 %2134 }
 0x5fe   :  { %v2139_v46 = vmul.f32 0.03125, %v2135_v19 }
 0x5ff   :  { %v2142_v20 = vadd.f32 1e-05, %v2140_v18 }
 0x600   :  { %v2141_v21 = vadd.f32 1e-05, %v2139_v46 }
 0x601   :  { %2816 = vrsqrt.f32 %v2142_v20 }
 0x602   :  { %2818 = vrsqrt.f32 %v2141_v21 }
 0x60b   :  { %v2817_v22 = vpop.eup %2816 }
 0x60c   :  { %v2819_v23 = vpop.eup %2818  ;;  %v2146_v48 = vmul.f32 %v2817_v22, %v2130_v2 }
 0x60d   :  { %v2145_v24 = vmul.f32 %v2819_v23, %v2129_v3 }
 0x60e   :  { %v2154_v49 = vmul.f32 %v2478_v47, %v2146_v48 }
 0x60f   :  { %v2153_v50 = vmul.f32 %v2478_v47, %v2145_v24 }
 0x610   :  { %v2162_v29 = vadd.f32 %v2479_v25, %v2154_v49 }
 0x611   :  { %v2161_v51 = vadd.f32 %v2479_v25, %v2153_v50 }
 0x613   :  { %2725 = vmatprep.mubr.msk.f32.mxu1 %vm2119_vm4, %v2161_v51 }
 0x614   :  { %2726 = vmatmul.mubr.msk.f32.vlgmr.msra.gmra.mrb[26].mxu1 %vm2119_vm4, %v2162_v29 }
 0x615   :  { %2758 = vmatpush3.bf16.msra.mxu1 %v2755_v16 }
 0x616   :  { %2760 = vmatprep.subr.bf16.mxu1 %v2759_v27 }
 0x619   :  { %2762 = vmatpush3.bf16.msra.mxu1 %v2759_v27 }
 0x61a   :  { %2764 = vmatprep.subr.bf16.mxu1 %v2763_v32 }
 0x61d   :  { %2766 = vmatpush3.bf16.msra.mxu1 %v2763_v32 }
 0x61e   :  { %2768 = vmatprep.subr.bf16.mxu1 %v2767_v35 }
 0x621   :  { %2770 = vmatpush3.bf16.msra.mxu1 %v2767_v35 }
 0x6e7   :  { %v2727_v37 = vpop.f32.mrb[26].mxu1 }
 0x6e8   :  { %v2252_v38 = vadd.f32 %v2727_v37, %v2480_v36  ;;  %v2246_v39 = vpop.f32.mrb[27].mxu1 }
 0x6e9   :  { %v2247_v40 = vadd.f32 %v2480_v36, %v2246_v39 }
 0x6ea   :  { %v2256_v42 = vmax.f32 %v2252_v38, 0.0 }
 0x6eb   :  { %v2255_v41 = vmax.f32 %v2247_v40, 0.0 }
 0x6ed   :  { %2744 = vmatprep.mubr.msk.f32.mxu1 %vm2272_vm5, %v2255_v41 }
 0x6ee   :  { %2745 = vmatmul.mubr.msk.f32.vlgmr.msra.gmra.mrb[28].mxu1 %vm2272_vm5, %v2256_v42 }
 0x7c1   :  { %v2746_v44 = vpop.f32.mrb[28].mxu1 }
 0x7c2   :  { %v2351_v45 = vadd.f32 %v2746_v44, %v2483_v43  ;;  %v2345_v52 = vpop.f32.mrb[29].mxu1 }
 0x7c3   :  { %v2346_v53 = vadd.f32 %v2483_v43, %v2345_v52 }
 0x7c4   :  { %v2355_v54 = vadd.f32 %v2351_v45, %v2162_v29 }
 0x7c5   :  { %v2354_v55 = vadd.f32 %v2346_v53, %v2161_v51 }
 0x7c6   :  { %v2361_v56 = vsel %vm2119_vm4, %v2355_v54, 0.0 }
 0x7c7   :  { %2362 = vadd.xlane.f32.xlu1 %v2361_v56  ;;  %v2358_v57 = vsel %vm2119_vm4, %v2354_v55, 0.0 }
 0x7c8   :  { %2359 = vadd.xlane.f32.xlu0 %v2358_v57 }
 0x854   :  { %v2363_v58 = vpop.xlane.xlu1 %2362 }
 0x855   :  { %v2365_v59 = vmul.f32 0.03125, %v2363_v58  ;;  %v2360_v60 = vpop.xlane.xlu0 %2359 }
 0x856   :  { %v2364_v61 = vmul.f32 0.03125, %v2360_v60 }
 0x857   :  { %v2367_v62 = vsub.f32 %v2355_v54, %v2365_v59 }
 0x858   :  { %v2366_v63 = vsub.f32 %v2354_v55, %v2364_v61 }
 0x859   :  { %v2369_v0 = vmul.f32 %v2367_v62, %v2367_v62 }
 0x85a   :  { %v2368_v1 = vmul.f32 %v2366_v63, %v2366_v63 }
 0x85b   :  { %v2373_v2 = vsel %vm2119_vm4, %v2369_v0, 0.0 }
 0x85c   :  { %2374 = vadd.xlane.f32.xlu1 %v2373_v2  ;;  %v2370_v3 = vsel %vm2119_vm4, %v2368_v1, 0.0 }
 0x85d   :  { %2371 = vadd.xlane.f32.xlu0 %v2370_v3 }
 0x8e9   :  { %v2375_v4 = vpop.xlane.xlu1 %2374 }
 0x8ea   :  { %v2377_v5 = vmul.f32 0.03125, %v2375_v4  ;;  %v2372_v6 = vpop.xlane.xlu0 %2371 }
 0x8eb   :  { %v2376_v7 = vmul.f32 0.03125, %v2372_v6 }
 0x8ec   :  { %v2379_v8 = vadd.f32 1e-05, %v2377_v5 }
 0x8ed   :  { %v2378_v9 = vadd.f32 1e-05, %v2376_v7 }
 0x8ee   :  { %2820 = vrsqrt.f32 %v2379_v8 }
 0x8ef   :  { %2822 = vrsqrt.f32 %v2378_v9 }
 0x8f8   :  { %v2821_v10 = vpop.eup %2820 }
 0x8f9   :  { %v2823_v12 = vpop.eup %2822  ;;  %v2383_v13 = vmul.f32 %v2821_v10, %v2367_v62 }
 0x8fa   :  { %v2382_v14 = vmul.f32 %v2823_v12, %v2366_v63 }
 0x8fb   :  { %v2391_v16 = vmul.f32 %v2486_v11, %v2383_v13 }
 0x8fc   :  { %v2390_v17 = vmul.f32 %v2486_v11, %v2382_v14 }
 0x8fd   :  { %v2399_v18 = vadd.f32 %v2487_v15, %v2391_v16 }
 0x8fe   :  { %v2398_v19 = vadd.f32 %v2487_v15, %v2390_v17 }
 0x8ff   :  { %2401 = vst.msk [vmem:[#allocation2 + $0x8] sm:$0xff] %vm2119_vm4, %v2399_v18 }
 0x900   :  { %2400 = vst.msk [vmem:[#allocation2] sm:$0xff] %vm2119_vm4, %v2398_v19 }
 0x901   :  { %2835 = shalt.err (!%p2832_p4)
}
 0x902   :  { %s2836_s24 = scalar_lea.hbm %s3292_s18, 256 }
 0x903   :  { %p2837_p5 = scmp.ne.s32.totalorder %s3292_s18, %s2836_s24  ;;  %p2840_p6 = scmp.lt.u32.totalorder %s2836_s24, %s3292_s18 }
 0x905   :  { %p2842_p7 = pnand %p2840_p6, %p2837_p5 }
 0x907   :  { %2845 = shalt.err (!%p2842_p7)
}
 0x908   :  { %s2851_s6 = smov 128   ;;  %s2852_s7 = smov 8  }
 0x909   :  { %2413 = dma.vmem_to_hbm [thread:$0]  %s2408_s0, 256, %s3292_s18, [#allocation3], %s2851_s6, %s2851_s6, %s2852_s7  }
 0x90a   :  { %2846 = dma.done.wait [#allocation3], 256  }
 0x90b   :  { %2847 = vsyncadd [#allocation3], 4294967040 }
 0x90c   :  { %2417 = vsyncpa [#allocation3], 1 }

</bundles_post_ra>
